<compile_context>
chip_gen: v5e
topology: v5e:2x2
jax: 0.10.0
libtpu: 0.0.40
codegen_flags: <defaults>
</compile_context>

<pallas_src>
import jax
import jax.numpy as jnp
from jax.experimental import pallas as pl
from jax.experimental.pallas import tpu as pltpu


def _copy_kernel(x_ref, o_ref):
    # Pure streaming copy: the only work is DMA (HBM <-> VMEM) + vld/vst.
    o_ref[...] = x_ref[...]


def unflatten_view(x, N=-1, C=128, H=7, W=7):
    """Recommended production path: zero-cost metadata reshape (== .view)."""
    flat = C * H * W
    if N == -1:
        assert x.size % flat == 0
        N = x.size // flat
    return jnp.reshape(x, (N, C, H, W))


def _sublane_multiple(dtype):
    """Minimum legal sublane multiple for a packed tile of this dtype."""
    itemsize = jnp.dtype(dtype).itemsize
    return max(8, 32 // max(1, itemsize))  # f32 -> 8, bf16 -> 16, int8/fp8 -> 32


def _hw_config():
    """(block_budget_bytes, vmem_limit_bytes, min_grid_steps) per generation."""
    block_budget = 8 << 20          # ~8 MiB blocks amortize per-step overhead
    vmem_limit = 64 << 20           # v5e/v6e: 128 MiB physical, 16/32 scoped
    min_steps = 2                   # always overlap read/write DMA

    vmem_cap = None
    try:
        vmem_cap = int(pltpu.get_tpu_info().vmem_capacity_bytes)
    except Exception:
        pass
    kind = ""
    try:
        kind = jax.devices()[0].device_kind.lower()
    except Exception:
        pass

    is_v7x = ("v7" in kind) or ("7x" in kind) or (
        vmem_cap is not None and vmem_cap <= (64 << 20))
    if is_v7x:
        # v7x: only 64 MiB VMEM/TC but 2 TCs -> keep resident < ~40 MiB and
        # make sure the row axis has enough steps to shard across both cores.
        vmem_limit = 40 << 20
        min_steps = 4
    return block_budget, vmem_limit, min_steps


def _choose_lane_width(total, max_lw, min_rows):
    """Largest multiple-of-128 divisor of `total` (<= max_lw) keeping
    rows = total // lw >= min_rows."""
    best = None
    cap = min(total, max_lw)
    lw = 128
    while lw <= cap:
        if total % lw == 0 and (total // lw) >= min_rows:
            best = lw
        lw += 128
    return best


def _copy_2d(x2d, tm, vmem_limit, total_bytes):
    """Row-tiled, lane-dense streaming copy of a 2D array."""
    rows, cols = x2d.shape
    return pl.pallas_call(
        _copy_kernel,
        out_shape=jax.ShapeDtypeStruct((rows, cols), x2d.dtype),
        grid_spec=pl.GridSpec(
            grid=(pl.cdiv(rows, tm),),
            in_specs=[pl.BlockSpec((tm, cols), lambda i: (i, 0))],
            out_specs=pl.BlockSpec((tm, cols), lambda i: (i, 0)),
        ),
        compiler_params=pltpu.CompilerParams(
            # Independent row tiles -> shard across v7x TensorCores;
            # measured no-op on single-TC v5e/v6e.
            dimension_semantics=("parallel",),
            vmem_limit_bytes=vmem_limit,
        ),
        # Pure memory traffic: read total_bytes + write total_bytes.
        cost_estimate=pl.CostEstimate(
            flops=0, transcendentals=0, bytes_accessed=2 * total_bytes),
    )(x2d)


def unflatten(x, N=-1, C=128, H=7, W=7):
    """Pallas equivalent of Unflatten.forward: x.view(N, C, H, W)."""
    flat = C * H * W
    if N == -1:
        assert x.size % flat == 0
        N = x.size // flat
    out_shape = (N, C, H, W)
    total = N * flat
    itemsize = jnp.dtype(x.dtype).itemsize
    total_bytes = total * itemsize

    sub = _sublane_multiple(x.dtype)
    block_budget, vmem_limit, min_steps = _hw_config()
    tiny = total_bytes < (512 * 1024)   # below this, pipelining can't pay off

    if total % 128 == 0:
        # --- Lane-dense, row-tiled path -------------------------------------
        max_lw = max(128, (block_budget // (sub * itemsize)) // 128 * 128)
        min_rows = 1 if tiny else min_steps * sub
        lw = _choose_lane_width(total, max_lw, min_rows)
        if lw is None:
            lw = _choose_lane_width(total, max_lw, 1)
        if lw is not None:
            rows = total // lw
            x2d = jnp.reshape(x, (rows, lw))   # same contiguous buffer, free
            if tiny or rows <= sub:
                tm = rows                      # full extent (always legal)
            else:
                # Block rows bounded by the budget, capped to guarantee at
                # least `min_steps` grid steps (read/write DMA overlap and
                # v7x megacore split); rounded to the dtype sublane multiple.
                budget_rows = max(
                    sub, (block_budget // (lw * itemsize)) // sub * sub)
                steps_cap = max(sub, (rows // min_steps) // sub * sub)
                tm = min(budget_rows, steps_cap)
            block_bytes = tm * lw * itemsize
            limit = max(vmem_limit, 4 * block_bytes + (1 << 20))
            out2d = _copy_2d(x2d, tm, limit, total_bytes)
            return jnp.reshape(out2d, out_shape)

    # --- Fallback: flat size has no multiple-of-128 factor ------------------
    # Row-tile over the leading axis with the full (odd) width as the last
    # dim (full-extent last dim satisfies the (8,128)-or-full rule).  VMEM
    # stays bounded and pipelined regardless of N.
    x2d = jnp.reshape(x, (N, flat))
    budget_rows = max(sub, (block_budget // (flat * itemsize)) // sub * sub)
    steps_cap = max(sub, (N // min_steps) // sub * sub)
    if N <= sub:
        tn = N                                  # full extent, single block
    elif tiny:
        tn = N if budget_rows >= N else budget_rows
    else:
        tn = min(budget_rows, steps_cap)
        if tn >= N:
            tn = N
    block_bytes = tn * flat * itemsize
    limit = max(vmem_limit, 4 * block_bytes + (1 << 20))
    out2d = _copy_2d(x2d, tn, limit, total_bytes)
    return jnp.reshape(out2d, out_shape)


if __name__ == "__main__":
    key = jax.random.PRNGKey(0)
    k1, k2, k3, k4 = jax.random.split(key, 4)

    # Test 1: tiny lane-dense path (flat = 4*16*16 = 1024, multiple of 128).
    N1, C1, H1, W1 = 2, 4, 16, 16
    x1 = jax.random.normal(k1, (N1, C1 * H1 * W1), dtype=jnp.float32)
    out1 = jax.block_until_ready(unflatten(x1, N=N1, C=C1, H=H1, W=W1))
    ref1 = jnp.reshape(x1, (N1, C1, H1, W1))
    assert out1.shape == (N1, C1, H1, W1)
    assert out1.dtype == x1.dtype
    assert bool(jnp.array_equal(out1, ref1))

    # Test 2: odd-width fallback path (flat = 8*7*7 = 392, not lane-dense).
    N2, C2, H2, W2 = 2, 8, 7, 7
    x2 = jax.random.normal(k2, (N2, C2 * H2 * W2), dtype=jnp.float32)
    out2 = jax.block_until_ready(unflatten(x2, N=N2, C=C2, H=H2, W=W2))
    ref2 = jnp.reshape(x2, (N2, C2, H2, W2))
    assert out2.shape == (N2, C2, H2, W2)
    assert out2.dtype == x2.dtype
    assert bool(jnp.array_equal(out2, ref2))

    # Test 3: multi-step pipelined f32 path (512 KiB -> >= 2 grid steps).
    N3, C3, H3, W3 = 4, 128, 16, 16
    x3 = jax.random.normal(k3, (N3, C3 * H3 * W3), dtype=jnp.float32)
    out3 = jax.block_until_ready(unflatten(x3, N=N3, C=C3, H=H3, W=W3))
    ref3 = jnp.reshape(x3, (N3, C3, H3, W3))
    assert bool(jnp.array_equal(out3, ref3))

    # Test 4: bf16 path (dtype-aware sublane multiple of 16).
    N4, C4, H4, W4 = 8, 128, 16, 16
    x4 = jax.random.normal(k4, (N4, C4 * H4 * W4), dtype=jnp.bfloat16)
    out4 = jax.block_until_ready(unflatten(x4, N=N4, C=C4, H=H4, W=W4))
    ref4 = jnp.reshape(x4, (N4, C4, H4, W4))
    assert out4.dtype == jnp.bfloat16
    assert bool(jnp.array_equal(out4, ref4))

    # Zero-cost view path (the real Unflatten equivalent) also agrees.
    assert bool(jnp.array_equal(unflatten_view(x1, N=N1, C=C1, H=H1, W=W1), ref1))

    print("KERNEL_OK")
</pallas_src>

<mosaic_0001>
module attributes {stable_mosaic.version = 11 : i64} {
  func.func @_copy_kernel(%arg0: i32, %arg1: memref<1x2048xf32, #tpu.memory_space<vmem>>, %arg2: memref<1x2048xf32, #tpu.memory_space<vmem>>) attributes {dimension_semantics = [#tpu.dimension_semantics<parallel>], iteration_bounds = array<i64: 1>, scalar_prefetch = 0 : i64, scratch_operands = 0 : i64, tpu.core_type = #tpu.core_type<tc>, window_params = [{transform_indices = @transform_0, window_bounds = array<i64: 1, 2048>}, {transform_indices = @transform_1, window_bounds = array<i64: 1, 2048>}]} {
    %c0 = arith.constant 0 : index
    %c0_0 = arith.constant 0 : index
    %0 = vector.load %arg1[%c0, %c0_0] : memref<1x2048xf32, #tpu.memory_space<vmem>>, vector<1x2048xf32>
    %c0_1 = arith.constant 0 : index
    %c0_2 = arith.constant 0 : index
    %1 = vector.load %arg2[%c0_1, %c0_2] : memref<1x2048xf32, #tpu.memory_space<vmem>>, vector<1x2048xf32>
    tpu.vector_store %arg2[%c0_1, %c0_2], %0 {strides = array<i32>} : memref<1x2048xf32, #tpu.memory_space<vmem>>, vector<1x2048xf32>,
    return
  }
  func.func @transform_0(%arg0: i32) -> (i32, i32) {
    %c0_i32 = arith.constant 0 : i32
    %c0_i32_0 = arith.constant 0 : i32
    return %arg0, %c0_i32 : i32, i32
  }
  func.func @transform_1(%arg0: i32) -> (i32, i32) {
    %c0_i32 = arith.constant 0 : i32
    %c0_i32_0 = arith.constant 0 : i32
    return %arg0, %c0_i32 : i32, i32
  }
}

</mosaic_0001>

<bundles_post_ra>
// kernel: tpu_custom_call.1
= control target key start
LH: loop header
LB: loop body
LE: loop exit
PB: predicated region body
PF: predicated region fallthrough
CT: control target
= control target key end

     0   :  { %6 = vsyncpa [#allocation3], 0  ;;  %s116_s0 = inlined_call_operand.hbm [shape: f32[1,2048], index: 0, kind: input, shape index: {}]   ;;  %s117_s1 = inlined_call_operand.hbm [shape: f32[1,2048], index: 1, kind: output, shape index: {}]  }
   0x1   :  { %7 = vsyncpa [#allocation4], 0  ;;  %s13_s8 = sshll.u32 %s116_s0, 4  ;;  %s98_s9 = smov [#allocation2]   ;;  %s14_s8 = int_to_ptr.hbm [resolvable:$true] %s13_s8 }
   0x2   :  { %s15_s10 = sshll.u32 %s98_s9, 4  ;;  %s16_s10 = int_to_ptr.vmem [resolvable:$true] %s15_s10 }
   0x3   :  { %18 = dma.hbm_to_vmem [thread:$0]  %s14_s8, 256, %s16_s10, [#allocation3]  }
   0x4   :  { %94 = dma.done.wait [#allocation3], 256  }
   0x5   :  { %95 = vsyncadd [#allocation3], 4294967040  ;;  %s99_s11 = smov [#allocation5]   ;;  %s34_s15 = sshll.u32 %s117_s1, 4  ;;  %v23_v0 = vld [vmem:[#allocation2] sm:$0xff]  ;;  %v24_v1 = vld [vmem:[#allocation2 + $0x8] sm:$0xff]  ;;  %s35_s15 = int_to_ptr.hbm [resolvable:$true] %s34_s15 }
   0x6   :  { %s32_s12 = sshll.u32 %s99_s11, 4  ;;  %25 = vst [vmem:[#allocation5] sm:$0xff] %v23_v0  ;;  %s33_s12 = int_to_ptr.vmem [resolvable:$true] %s32_s12 }
   0x7   :  { %26 = vst [vmem:[#allocation5 + $0x8] sm:$0xff] %v24_v1 }
   0x8   :  { %37 = dma.vmem_to_hbm [thread:$0]  %s33_s12, 256, %s35_s15, [#allocation4]  }
   0x9   :  { %96 = dma.done.wait [#allocation4], 256  }
   0xa   :  { %97 = vsyncadd [#allocation4], 4294967040 }
   0xb   :  { %42 = vsyncpa [#allocation3], 1 }
   0xc   :  { %43 = vsyncpa [#allocation4], 1 }

</bundles_post_ra>
